<compile_context>
chip_gen: v7x
topology: tpu7x:2x2x1
jax: 0.10.0
libtpu: 0.0.40
codegen_flags: <defaults>
</compile_context>

<pallas_src>
import functools

import jax
import jax.numpy as jnp
from jax.experimental import pallas as pl
from jax.experimental.pallas import tpu as pltpu

_LANE = 128
_SUBLANE = 8


def _round_up(x, m):
    return (x + m - 1) // m * m


def _policy_head_kernel(feat_ref, w_ref, b_ref, out_ref, *, num_actions):
    """Linear head + log-softmax + per-sample entropy, one lane-dense store.

    out[:, :A]   = log-softmax(features @ W + b)
    out[:,  A]   = per-sample entropy  -sum(p * log p)
    out[:, A+1:] = 0
    """
    feats = feat_ref[...]                                   # [TB, H]  f32
    w = w_ref[...]                                          # [H, A_pad]
    b = b_ref[...]                                          # [1, A_pad]

    # logits = features @ W + b   (MXU, f32 accumulate)
    logits = jnp.dot(feats, w, preferred_element_type=jnp.float32) + b  # [TB, A_pad]

    # Mask padded action lanes so they never win the max / contribute to sums.
    lane = jax.lax.broadcasted_iota(jnp.int32, logits.shape, 1)          # [TB, A_pad]
    valid = lane < num_actions
    logits = jnp.where(valid, logits, jnp.float32(-1e30))

    # Numerically-stable log-softmax (VPU + XLU reductions, exp/log on EUP).
    m = jnp.max(logits, axis=-1, keepdims=True)                          # [TB, 1]
    shifted = logits - m
    exp = jnp.where(valid, jnp.exp(shifted), 0.0)
    denom = jnp.sum(exp, axis=-1, keepdims=True)                         # [TB, 1]
    logp = shifted - jnp.log(denom)                                      # [TB, A_pad]

    # probs via exp(logp): keeps the whole softmax path on the EUP (no divide).
    probs = jnp.exp(logp)                                                # [TB, A_pad]

    # per-sample entropy: -sum(p * log p) over valid action lanes
    ent = -jnp.sum(jnp.where(valid, probs * logp, 0.0),
                   axis=-1, keepdims=True)                               # [TB, 1]

    # Assemble the lane-dense slab: logp in the action lanes, entropy in lane A.
    ent_lane = lane == num_actions
    out_ref[...] = jnp.where(valid, logp, jnp.where(ent_lane, ent, 0.0))


@jax.jit
def policy_head(features, w, b):
    """features: [B,H] f32, w: [H,A] f32, b: [1,A] f32 -> (logp [B,A], ent [B,1])."""
    B, H = features.shape
    Hw, A = w.shape
    assert H == Hw and b.shape == (1, A)

    # Batch tile: multiple of 8 (sublane), capped so double-buffered
    # (TB,H)+(TB,A_pad) tiles comfortably fit the v7x 32 MiB scoped VMEM.
    TB = 256 if B >= 256 else _round_up(B, _SUBLANE)
    B_pad = _round_up(B, TB)
    A_pad = _round_up(A + 1, _LANE)          # +1 lane carries per-sample entropy

    feats_p = features if B_pad == B else jnp.pad(features, ((0, B_pad - B), (0, 0)))
    w_p = jnp.pad(w, ((0, 0), (0, A_pad - A)))
    b_p = jnp.pad(b, ((0, 0), (0, A_pad - A)))

    grid = (B_pad // TB,)
    grid_spec = pl.GridSpec(
        grid=grid,
        in_specs=[
            pl.BlockSpec((TB, H), lambda i: (i, 0)),       # batch-tiled features
            pl.BlockSpec((H, A_pad), lambda i: (0, 0)),    # W resident across tiles
            pl.BlockSpec((1, A_pad), lambda i: (0, 0)),    # bias resident
        ],
        out_specs=pl.BlockSpec((TB, A_pad), lambda i: (i, 0)),
    )

    out = pl.pallas_call(
        functools.partial(_policy_head_kernel, num_actions=A),
        out_shape=jax.ShapeDtypeStruct((B_pad, A_pad), jnp.float32),
        grid_spec=grid_spec,
        compiler_params=pltpu.CompilerParams(
            dimension_semantics=("parallel",)),
    )(feats_p, w_p, b_p)

    logp = out[:B, :A]
    ent = out[:B, A:A + 1]
    return logp, ent


# ----------------------------- Policy wrapper ------------------------------

class PallasDiscretePolicy:
    """JAX/Pallas re-implementation of Policy (Discrete action space)."""

    def __init__(self, encoder_output_size, num_actions, key):
        kw, kb = jax.random.split(key)
        # Deterministic synthetic init (Categorical head in the reference uses
        # a small-gain init; exact values don't matter here).
        self.w = (jax.random.normal(kw, (encoder_output_size, num_actions),
                                    dtype=jnp.float32) * 0.01)
        self.b = (jax.random.normal(kb, (1, num_actions),
                                    dtype=jnp.float32) * 0.01)

    def act(self, features, deterministic=False, key=None):
        logp, _ = policy_head(features, self.w, self.b)
        if deterministic:
            # mode(): argmax over logp == argmax over probs/logits
            action = jnp.argmax(logp, axis=-1, keepdims=True)
        else:
            # Categorical sample via Gumbel-max on logp (logits - rowwise const).
            g = -jnp.log(-jnp.log(
                jax.random.uniform(key, logp.shape, minval=1e-20, maxval=1.0)))
            action = jnp.argmax(logp + g, axis=-1, keepdims=True)
        action_log_probs = jnp.take_along_axis(logp, action, axis=-1)  # [B,1]
        probs = jnp.exp(logp)                                          # dist.probs
        return action, action_log_probs, probs

    def evaluate_actions(self, features, action):
        logp, ent = policy_head(features, self.w, self.b)
        action_log_probs = jnp.take_along_axis(logp, action, axis=-1)  # [B,1]
        dist_entropy = jnp.mean(ent)                                   # scalar
        return action_log_probs, dist_entropy


# --------------------------------- main ------------------------------------

if __name__ == "__main__":
    B, H, A = 8, 32, 6   # batch, encoder_output_size, action_space.n

    root = jax.random.PRNGKey(0)
    k_feat, k_param, k_sample = jax.random.split(root, 3)

    features = jax.random.normal(k_feat, (B, H), dtype=jnp.float32)
    policy = PallasDiscretePolicy(H, A, k_param)

    # act (deterministic = mode)
    action, alp, probs = policy.act(features, deterministic=True)
    jax.block_until_ready((action, alp, probs))

    # act (stochastic sample)
    action_s, alp_s, _ = policy.act(features, deterministic=False, key=k_sample)
    jax.block_until_ready((action_s, alp_s))

    # evaluate_actions
    eval_alp, dist_entropy = policy.evaluate_actions(features, action)
    jax.block_until_ready((eval_alp, dist_entropy))

    # cross-check kernel against a pure-JAX reference
    logits_ref = features @ policy.w + policy.b
    probs_ref = jax.nn.softmax(logits_ref, axis=-1)
    logp_ref = jax.nn.log_softmax(logits_ref, axis=-1)
    ent_ref = -jnp.sum(probs_ref * logp_ref, axis=-1).mean()

    logp_k, ent_k = policy_head(features, policy.w, policy.b)
    action_ref = jnp.argmax(logits_ref, axis=-1, keepdims=True)

    assert jnp.allclose(logp_k, logp_ref, atol=1e-5)
    assert jnp.allclose(probs, probs_ref, atol=1e-5)
    assert jnp.allclose(jnp.mean(ent_k), ent_ref, atol=1e-5)
    assert jnp.allclose(dist_entropy, ent_ref, atol=1e-5)
    assert jnp.array_equal(action, action_ref)
    assert jnp.allclose(alp, jnp.take_along_axis(logp_ref, action_ref, axis=-1),
                        atol=1e-5)
    assert alp.shape == (B, 1) and action.shape == (B, 1) and probs.shape == (B, A)
    assert eval_alp.shape == (B, 1)

    print("KERNEL_OK")
</pallas_src>

<mosaic_0001>
module attributes {stable_mosaic.version = 11 : i64} {
  func.func @_policy_head_kernel(%arg0: i32, %arg1: memref<8x32xf32, #tpu.memory_space<vmem>>, %arg2: memref<32x128xf32, #tpu.memory_space<vmem>>, %arg3: memref<1x128xf32, #tpu.memory_space<vmem>>, %arg4: memref<8x128xf32, #tpu.memory_space<vmem>>) attributes {dimension_semantics = [#tpu.dimension_semantics<parallel>], iteration_bounds = array<i64: 1>, scalar_prefetch = 0 : i64, scratch_operands = 0 : i64, tpu.core_type = #tpu.core_type<tc>, window_params = [{transform_indices = @transform_0, window_bounds = array<i64: 8, 32>}, {pipeline_mode = #tpu.pipeline_mode<synchronous>, transform_indices = @transform_1, window_bounds = array<i64: 32, 128>}, {pipeline_mode = #tpu.pipeline_mode<synchronous>, transform_indices = @transform_2, window_bounds = array<i64: 1, 128>}, {transform_indices = @transform_3, window_bounds = array<i64: 8, 128>}]} {
    %c0 = arith.constant 0 : index
    %c0_0 = arith.constant 0 : index
    %0 = vector.load %arg1[%c0, %c0_0] : memref<8x32xf32, #tpu.memory_space<vmem>>, vector<8x32xf32>
    %c0_1 = arith.constant 0 : index
    %c0_2 = arith.constant 0 : index
    %1 = vector.load %arg2[%c0_1, %c0_2] : memref<32x128xf32, #tpu.memory_space<vmem>>, vector<32x128xf32>
    %c0_3 = arith.constant 0 : index
    %c0_4 = arith.constant 0 : index
    %2 = vector.load %arg3[%c0_3, %c0_4] : memref<1x128xf32, #tpu.memory_space<vmem>>, vector<1x128xf32>
    %cst = arith.constant dense<0.000000e+00> : vector<8x128xf32>
    %3 = tpu.matmul %0, %1, %cst {dimension_numbers = #tpu.dot_dimension_numbers<[1], [0], [0], [1], [0, 0, 1, 1], [], []>} : vector<8x32xf32>, vector<32x128xf32>, vector<8x128xf32> -> vector<8x128xf32>
    %4 = vector.broadcast %2 : vector<1x128xf32> to vector<8x128xf32>
    %5 = arith.addf %3, %4 : vector<8x128xf32>
    %6 = tpu.iota {dimensions = array<i32: 1>} : vector<8x128xi32>
    %c6_i32 = arith.constant 6 : i32
    %7 = vector.broadcast %c6_i32 : i32 to vector<8x128xi32>
    %8 = arith.cmpi slt, %6, %7 : vector<8x128xi32>
    %cst_5 = arith.constant -1.000000e+30 : f32
    %9 = vector.broadcast %cst_5 : f32 to vector<8x128xf32>
    %10 = arith.select %8, %5, %9 : vector<8x128xi1>, vector<8x128xf32>
    %cst_6 = arith.constant dense<0xFF800000> : vector<8xf32>
    %11 = vector.multi_reduction <maximumf>, %10, %cst_6 [1] : vector<8x128xf32> to vector<8xf32>
    %12 = vector.shape_cast %11 : vector<8xf32> to vector<8x1xf32>
    %13 = vector.broadcast %12 : vector<8x1xf32> to vector<8x128xf32>
    %14 = arith.subf %10, %13 : vector<8x128xf32>
    %15 = math.exp %14 : vector<8x128xf32>
    %cst_7 = arith.constant 0.000000e+00 : f32
    %16 = vector.broadcast %cst_7 : f32 to vector<8x128xf32>
    %17 = arith.select %8, %15, %16 : vector<8x128xi1>, vector<8x128xf32>
    %cst_8 = arith.constant dense<0.000000e+00> : vector<8xf32>
    %18 = vector.multi_reduction <add>, %17, %cst_8 [1] : vector<8x128xf32> to vector<8xf32>
    %19 = vector.shape_cast %18 : vector<8xf32> to vector<8x1xf32>
    %20 = math.log %19 : vector<8x1xf32>
    %21 = vector.broadcast %20 : vector<8x1xf32> to vector<8x128xf32>
    %22 = arith.subf %14, %21 : vector<8x128xf32>
    %23 = math.exp %22 : vector<8x128xf32>
    %24 = arith.mulf %23, %22 : vector<8x128xf32>
    %cst_9 = arith.constant 0.000000e+00 : f32
    %25 = vector.broadcast %cst_9 : f32 to vector<8x128xf32>
    %26 = arith.select %8, %24, %25 : vector<8x128xi1>, vector<8x128xf32>
    %cst_10 = arith.constant dense<0.000000e+00> : vector<8xf32>
    %27 = vector.multi_reduction <add>, %26, %cst_10 [1] : vector<8x128xf32> to vector<8xf32>
    %28 = vector.shape_cast %27 : vector<8xf32> to vector<8x1xf32>
    %cst_11 = arith.constant 0.000000e+00 : f32
    %29 = vector.broadcast %cst_11 : f32 to vector<8x1xf32>
    %30 = arith.subf %29, %28 : vector<8x1xf32>
    %c6_i32_12 = arith.constant 6 : i32
    %31 = vector.broadcast %c6_i32_12 : i32 to vector<8x128xi32>
    %32 = arith.cmpi eq, %6, %31 : vector<8x128xi32>
    %cst_13 = arith.constant 0.000000e+00 : f32
    %33 = vector.shape_cast %30 : vector<8x1xf32> to vector<8x1xf32>
    %34 = vector.broadcast %33 : vector<8x1xf32> to vector<8x128xf32>
    %35 = vector.broadcast %cst_13 : f32 to vector<8x128xf32>
    %36 = arith.select %32, %34, %35 : vector<8x128xi1>, vector<8x128xf32>
    %37 = arith.select %8, %22, %36 : vector<8x128xi1>, vector<8x128xf32>
    %c0_14 = arith.constant 0 : index
    %c0_15 = arith.constant 0 : index
    %38 = vector.load %arg4[%c0_14, %c0_15] : memref<8x128xf32, #tpu.memory_space<vmem>>, vector<8x128xf32>
    tpu.vector_store %arg4[%c0_14, %c0_15], %37 {strides = array<i32>} : memref<8x128xf32, #tpu.memory_space<vmem>>, vector<8x128xf32>,
    return
  }
  func.func @transform_0(%arg0: i32) -> (i32, i32) {
    %c0_i32 = arith.constant 0 : i32
    %c0_i32_0 = arith.constant 0 : i32
    return %arg0, %c0_i32 : i32, i32
  }
  func.func @transform_1(%arg0: i32) -> (i32, i32) {
    %c0_i32 = arith.constant 0 : i32
    %c0_i32_0 = arith.constant 0 : i32
    %c0_i32_1 = arith.constant 0 : i32
    return %c0_i32, %c0_i32_0 : i32, i32
  }
  func.func @transform_2(%arg0: i32) -> (i32, i32) {
    %c0_i32 = arith.constant 0 : i32
    %c0_i32_0 = arith.constant 0 : i32
    %c0_i32_1 = arith.constant 0 : i32
    return %c0_i32, %c0_i32_0 : i32, i32
  }
  func.func @transform_3(%arg0: i32) -> (i32, i32) {
    %c0_i32 = arith.constant 0 : i32
    %c0_i32_0 = arith.constant 0 : i32
    return %arg0, %c0_i32 : i32, i32
  }
}

</mosaic_0001>

<bundles_post_ra>
// kernel: policy_head.1
= control target key start
LH: loop header
LB: loop body
LE: loop exit
PB: predicated region body
PF: predicated region fallthrough
CT: control target
= control target key end

     0   :  { %v163_v0 = vmov 0.0|0.0   ;;  %vm164_vm0 = vmmov 0   ;;  %v165_v4 = vmov 0.0   ;;  %vm26_vm1 = vcmask 261120   ;;  %s211_s1 = inlined_call_operand.vmem [shape: f32[32,128], index: 1, kind: input, shape index: {}]   ;;  %s212_s0 = inlined_call_operand.vmem [shape: f32[8,32], index: 0, kind: input, shape index: {}]   ;;  %s213_s2 = inlined_call_operand.vmem [shape: f32[1,128], index: 2, kind: input, shape index: {}]   ;;  %s214_s3 = inlined_call_operand.vmem [shape: f32[8,128], index: 3, kind: output, shape index: {}]  }
   0x1   :  { %148 = vmatprep.subr.bf16.mxu0 %v163_v0  ;;  %v15_v1 = vld [vmem:[%s211_s1] sm:$0xff]  ;;  %v16_v2 = vld [vmem:[%s211_s1 + $0x8] sm:$0xff]  ;;  %v17_v3 = vld [vmem:[%s211_s1 + $0x10] sm:$0xff]  ;;  %145 = vmatprep.mubr.msk.f32.mxu0 %vm164_vm0, %v165_v4  ;;  %v100_v9 = vlaneseq }
   0x2   :  { %v149_v5 = vpack.c.bf16 %v16_v2, %v15_v1  ;;  %v18_v6 = vld [vmem:[%s211_s1 + $0x18] sm:$0xff]  ;;  %v14_v8 = vld [vmem:[%s212_s0] sm:$0xff] }
   0x3   :  { %v152_v7 = vpack.c.bf16 %v18_v6, %v17_v3  ;;  %v101_v10 = vand.u32 127, %v100_v9  ;;  %v130_v11 = vld [vmem:[%s213_s2] ss:$0 sm:$0xff] }
   0x4   :  { %150 = vmatpush3.bf16.msra.mxu0 %v149_v5 }
   0x5   :  { %151 = vmatprep.subr.bf16.mxu0 %v163_v0  ;;  %vm102_vm2 = vcmp.lt.s32.totalorder %v101_v10, 6  ;;  %vm122_vm3 = vcmp.eq.s32.totalorder %v101_v10, 6 }
   0x8   :  { %153 = vmatpush3.bf16.msra.mxu0 %v152_v7 }
   0xb   :  { %146 = vmatmul.mubr.msk.f32.vlgmr.msra.gmra.mrb[0].mxu0 %vm26_vm1, %v14_v8 }
  0xde   :  { %v96_v12 = vpop.f32.mrb[0].mxu0 }
  0xdf   :  { %v97_v13 = vadd.f32 %v130_v11, %v96_v12  ;;  %v147_v14 = vpop.f32.mrb[1].mxu0 }
  0xe1   :  { %v103_v15 = vsel %vm102_vm2, %v97_v13, -1e+30 }
  0xe2   :  { %104 = vmax.xlane.f32.xlu0 %v103_v15 }
 0x16f   :  { %v105_v16 = vpop.xlane.xlu0 %104 }
 0x170   :  { %v106_v17 = vsub.f32 %v103_v15, %v105_v16 }
 0x172   :  { %v107_v18 = vmul.f32 1.442695, %v106_v17 }
 0x174   :  { %157 = vpow2.f32 %v107_v18 }
 0x17e   :  { %v158_v19 = vpop.eup %157 }
 0x17f   :  { %v109_v20 = vsel %vm102_vm2, %v158_v19, 0.0 }
 0x180   :  { %110 = vadd.xlane.f32.xlu0 %v109_v20 }
 0x20d   :  { %v111_v21 = vpop.xlane.xlu0 %110 }
 0x20e   :  { %159 = vlog2.f32 %v111_v21 }
 0x218   :  { %v160_v22 = vpop.eup %159 }
 0x219   :  { %v113_v23 = vmul.f32 0.6931472, %v160_v22 }
 0x21b   :  { %v114_v24 = vsub.f32 %v106_v17, %v113_v23 }
 0x21d   :  { %v115_v25 = vmul.f32 1.442695, %v114_v24 }
 0x21f   :  { %161 = vpow2.f32 %v115_v25 }
 0x229   :  { %v162_v26 = vpop.eup %161 }
 0x22a   :  { %v117_v27 = vmul.f32 %v162_v26, %v114_v24 }
 0x22c   :  { %v118_v28 = vsel %vm102_vm2, %v117_v27, 0.0 }
 0x22d   :  { %119 = vadd.xlane.f32.xlu1 %v118_v28 }
 0x2ba   :  { %v120_v29 = vpop.xlane.xlu1 %119 }
 0x2bb   :  { %v121_v30 = vsub.f32 0.0, %v120_v29 }
 0x2bd   :  { %v123_v31 = vsel %vm122_vm3, %v121_v30, 0.0 }
 0x2be   :  { %v124_v32 = vsel %vm102_vm2, %v114_v24, %v123_v31 }
 0x2bf   :  { %125 = vst [vmem:[%s214_s3] sm:$0xff] %v124_v32 }

</bundles_post_ra>
